<compile_context>
chip_gen: v7x
topology: tpu7x:2x2x1
jax: 0.10.0
libtpu: 0.0.40
codegen_flags: <defaults>
</compile_context>

<pallas_src>
import functools
import math

import jax
import jax.numpy as jnp
from jax.experimental import pallas as pl
from jax.experimental.pallas import tpu as pltpu


def _arc_margin_kernel(x_ref, wt_ref, label_ref, out_ref, loss_ref,
                       *, s, cos_m, sin_m):
    x = x_ref[...]            # (IN=2, TB) f32, batch on the lane axis
    wt = wt_ref[...]          # (OUT=10, IN=2) f32 (weight transposed, resident)
    lbl = label_ref[...]      # (1, TB) int32

    # F.normalize(x, dim=1): per-sample L2 norm == per-lane; width-2 reduce as adds
    # (no XLU), rsqrt on the EUP instead of sqrt + divide.
    # max(sqrt(n2), 1e-12) == sqrt(max(n2, 1e-24))
    xsq = x * x
    x_inv = jax.lax.rsqrt(jnp.maximum(xsq[0:1, :] + xsq[1:2, :], 1e-24))   # (1, TB)
    xn = x * x_inv

    # F.normalize(weight, dim=0): per-class L2 over the 2 input features.
    wsq = wt * wt
    w_inv = jax.lax.rsqrt(jnp.maximum(wsq[:, 0:1] + wsq[:, 1:2], 1e-24))   # (OUT, 1)
    wn = wt * w_inv

    # cosine[o, b] = sum_k wn[o, k] * xn[k, b] : two VPU FMAs (outer products).
    # MXU skipped on purpose (K=2, N=10 would waste the whole systolic array).
    cosine = wn[:, 0:1] * xn[0:1, :] + wn[:, 1:2] * xn[1:2, :]             # (OUT, TB)
    cosine = jnp.clip(cosine, -1.0, 1.0)

    sine = jnp.sqrt(jnp.maximum(1.0 - cosine * cosine, 1e-07))
    phi = cosine * cos_m - sine * sin_m
    # NOTE: the reference module applies phi unconditionally at the label position
    # (no th/mm easy-margin branch), so none is added here.

    n_cls, n_b = cosine.shape
    cls = jax.lax.broadcasted_iota(jnp.int32, (n_cls, n_b), 0)
    is_target = cls == lbl                                                 # (OUT, TB)
    output = jnp.where(is_target, phi, cosine) * s                         # vselect
    out_ref[...] = output.astype(out_ref.dtype)                            # dense store

    # Per-sample cross entropy: logsumexp over classes (sublane axis) - target logit.
    mx = jnp.max(output, axis=0, keepdims=True)                            # (1, TB)
    lse = jnp.log(jnp.sum(jnp.exp(output - mx), axis=0, keepdims=True)) + mx
    tgt = jnp.sum(jnp.where(is_target, output, 0.0), axis=0, keepdims=True)
    loss_ref[...] = (lse - tgt).astype(loss_ref.dtype)                     # (1, TB)


def arc_margin_forward(x, weight, label, *, s=32.0, m=0.5, tb=512):
    """x: (B, 2) float, weight: (2, 10) float (PyTorch layout), label: (B,) int.

    Returns (output (B, 10) f32, loss scalar f32), matching the PyTorch forward.
    """
    b, in_feature = x.shape
    out_feature = weight.shape[1]

    # Single cast here; kernel runs in f32 (v5e VPU/EUP have no bf16).
    # TODO(synk): for very large B with bf16 activations, pass x as bf16 and upcast
    # in-kernel to halve the HBM->VMEM DMA bytes.
    x_t = x.astype(jnp.float32).T                   # (IN, B): batch on lanes
    w_t = weight.astype(jnp.float32).T              # (OUT, IN), tiny, stays resident
    label2d = label.astype(jnp.int32).reshape(1, b)

    # Batch tile: lane-aligned (multiple of 128) unless a single block covers B.
    if tb >= b:
        tb = b
    else:
        tb = max(128, (tb // 128) * 128)
    num_tiles = pl.cdiv(b, tb)

    kernel = functools.partial(
        _arc_margin_kernel, s=float(s), cos_m=math.cos(m), sin_m=math.sin(m))

    out_t, loss_per_sample = pl.pallas_call(
        kernel,
        out_shape=(
            jax.ShapeDtypeStruct((out_feature, b), jnp.float32),   # logits, transposed
            jax.ShapeDtypeStruct((1, b), jnp.float32),             # per-sample CE loss
        ),
        grid=(num_tiles,),
        in_specs=[
            pl.BlockSpec((in_feature, tb), lambda i: (0, i)),            # x^T tile
            pl.BlockSpec((out_feature, in_feature), lambda i: (0, 0)),   # weight^T
            pl.BlockSpec((1, tb), lambda i: (0, i)),                     # labels tile
        ],
        out_specs=(
            pl.BlockSpec((out_feature, tb), lambda i: (0, i)),
            pl.BlockSpec((1, tb), lambda i: (0, i)),
        ),
        compiler_params=pltpu.CompilerParams(
            dimension_semantics=("parallel",)),
    )(x_t, w_t, label2d)

    # Tiny XLA epilogue: back to PyTorch (B, OUT) layout + mean over batch. Keeping
    # the mean outside the kernel keeps the batch grid axis dependency-free.
    return out_t.T, jnp.mean(loss_per_sample)


def init_weight(key, in_feature=2, out_feature=10):
    # nn.init.xavier_uniform_ on (2, 10): U(-a, a), a = sqrt(6/(fan_in+fan_out))
    a = math.sqrt(6.0 / (in_feature + out_feature))
    w = jax.random.uniform(key, (in_feature, out_feature),
                           minval=-a, maxval=a, dtype=jnp.float32)
    # weight.data.renorm_(2, 1, 1e-05).mul_(100000.0): per-column L2 maxnorm renorm
    col_norm = jnp.sqrt(jnp.sum(w * w, axis=0, keepdims=True))
    scale = jnp.where(col_norm > 1e-05, 1e-05 / (col_norm + 1e-07), 1.0)
    return (w * scale) * 100000.0


def _reference_forward(x, weight, label, *, s=32.0, m=0.5):
    # Pure-JAX reference of the PyTorch forward, for a correctness check.
    xn = x / jnp.maximum(jnp.linalg.norm(x, axis=1, keepdims=True), 1e-12)
    wn = weight / jnp.maximum(jnp.linalg.norm(weight, axis=0, keepdims=True), 1e-12)
    cosine = jnp.clip(xn @ wn, -1.0, 1.0)
    sine = jnp.sqrt(jnp.maximum(1.0 - cosine * cosine, 1e-07))
    phi = cosine * math.cos(m) - sine * math.sin(m)
    one_hot = jax.nn.one_hot(label, weight.shape[1], dtype=jnp.float32)
    output = (one_hot * phi + (1.0 - one_hot) * cosine) * s
    lse = jax.scipy.special.logsumexp(output, axis=1)
    tgt = jnp.take_along_axis(output, label[:, None], axis=1)[:, 0]
    return output, jnp.mean(lse - tgt)


if __name__ == "__main__":
    key = jax.random.PRNGKey(0)
    k_w, k_x, k_l = jax.random.split(key, 3)

    in_feature, out_feature, batch = 2, 10, 256
    weight = init_weight(k_w, in_feature, out_feature)
    x = jax.random.normal(k_x, (batch, in_feature), dtype=jnp.float32)
    label = jax.random.randint(k_l, (batch,), 0, out_feature, dtype=jnp.int32)

    # tb=128 -> grid of 2 batch tiles, exercising the pipelined / parallel axis.
    out, loss = arc_margin_forward(x, weight, label, s=32.0, m=0.5, tb=128)
    jax.block_until_ready((out, loss))

    ref_out, ref_loss = _reference_forward(x, weight, label, s=32.0, m=0.5)
    assert jnp.allclose(out, ref_out, atol=5e-2, rtol=1e-3), "logits mismatch"
    assert jnp.allclose(loss, ref_loss, atol=1e-3, rtol=1e-3), "loss mismatch"

    print("KERNEL_OK")
</pallas_src>

<mosaic_0001>
module attributes {stable_mosaic.version = 11 : i64} {
  func.func @_arc_margin_kernel(%arg0: i32, %arg1: memref<2x128xf32, #tpu.memory_space<vmem>>, %arg2: memref<10x2xf32, #tpu.memory_space<vmem>>, %arg3: memref<1x128xi32, #tpu.memory_space<vmem>>, %arg4: memref<10x128xf32, #tpu.memory_space<vmem>>, %arg5: memref<1x128xf32, #tpu.memory_space<vmem>>) attributes {dimension_semantics = [#tpu.dimension_semantics<parallel>], iteration_bounds = array<i64: 2>, scalar_prefetch = 0 : i64, scratch_operands = 0 : i64, tpu.core_type = #tpu.core_type<tc>, window_params = [{transform_indices = @transform_0, window_bounds = array<i64: 2, 128>}, {pipeline_mode = #tpu.pipeline_mode<synchronous>, transform_indices = @transform_1, window_bounds = array<i64: 10, 2>}, {transform_indices = @transform_2, window_bounds = array<i64: 1, 128>}, {transform_indices = @transform_3, window_bounds = array<i64: 10, 128>}, {transform_indices = @transform_4, window_bounds = array<i64: 1, 128>}]} {
    %c0 = arith.constant 0 : index
    %c0_0 = arith.constant 0 : index
    %0 = vector.load %arg1[%c0, %c0_0] : memref<2x128xf32, #tpu.memory_space<vmem>>, vector<2x128xf32>
    %c0_1 = arith.constant 0 : index
    %c0_2 = arith.constant 0 : index
    %1 = vector.load %arg2[%c0_1, %c0_2] : memref<10x2xf32, #tpu.memory_space<vmem>>, vector<10x2xf32>
    %c0_3 = arith.constant 0 : index
    %c0_4 = arith.constant 0 : index
    %2 = vector.load %arg3[%c0_3, %c0_4] : memref<1x128xi32, #tpu.memory_space<vmem>>, vector<1x128xi32>
    %3 = arith.mulf %0, %0 : vector<2x128xf32>
    %4 = vector.extract_strided_slice %3 {offsets = [0, 0], sizes = [1, 128], strides = [1, 1]} : vector<2x128xf32> to vector<1x128xf32>
    %5 = vector.extract_strided_slice %3 {offsets = [1, 0], sizes = [1, 128], strides = [1, 1]} : vector<2x128xf32> to vector<1x128xf32>
    %6 = arith.addf %4, %5 : vector<1x128xf32>
    %cst = arith.constant 1.000000e-24 : f32
    %7 = vector.broadcast %cst : f32 to vector<1x128xf32>
    %8 = arith.maximumf %6, %7 : vector<1x128xf32>
    %9 = math.rsqrt %8 : vector<1x128xf32>
    %10 = vector.broadcast %9 : vector<1x128xf32> to vector<2x128xf32>
    %11 = arith.mulf %0, %10 : vector<2x128xf32>
    %12 = arith.mulf %1, %1 : vector<10x2xf32>
    %13 = vector.extract_strided_slice %12 {offsets = [0, 0], sizes = [10, 1], strides = [1, 1]} : vector<10x2xf32> to vector<10x1xf32>
    %14 = vector.extract_strided_slice %12 {offsets = [0, 1], sizes = [10, 1], strides = [1, 1]} : vector<10x2xf32> to vector<10x1xf32>
    %15 = arith.addf %13, %14 : vector<10x1xf32>
    %cst_5 = arith.constant 1.000000e-24 : f32
    %16 = vector.broadcast %cst_5 : f32 to vector<10x1xf32>
    %17 = arith.maximumf %15, %16 : vector<10x1xf32>
    %18 = math.rsqrt %17 : vector<10x1xf32>
    %19 = vector.broadcast %18 : vector<10x1xf32> to vector<10x2xf32>
    %20 = arith.mulf %1, %19 : vector<10x2xf32>
    %21 = vector.extract_strided_slice %20 {offsets = [0, 0], sizes = [10, 1], strides = [1, 1]} : vector<10x2xf32> to vector<10x1xf32>
    %22 = vector.extract_strided_slice %11 {offsets = [0, 0], sizes = [1, 128], strides = [1, 1]} : vector<2x128xf32> to vector<1x128xf32>
    %23 = vector.broadcast %21 : vector<10x1xf32> to vector<10x128xf32>
    %24 = vector.broadcast %22 : vector<1x128xf32> to vector<10x128xf32>
    %25 = arith.mulf %23, %24 : vector<10x128xf32>
    %26 = vector.extract_strided_slice %20 {offsets = [0, 1], sizes = [10, 1], strides = [1, 1]} : vector<10x2xf32> to vector<10x1xf32>
    %27 = vector.extract_strided_slice %11 {offsets = [1, 0], sizes = [1, 128], strides = [1, 1]} : vector<2x128xf32> to vector<1x128xf32>
    %28 = vector.broadcast %26 : vector<10x1xf32> to vector<10x128xf32>
    %29 = vector.broadcast %27 : vector<1x128xf32> to vector<10x128xf32>
    %30 = arith.mulf %28, %29 : vector<10x128xf32>
    %31 = arith.addf %25, %30 : vector<10x128xf32>
    %cst_6 = arith.constant -1.000000e+00 : f32
    %cst_7 = arith.constant 1.000000e+00 : f32
    %32 = vector.broadcast %cst_6 : f32 to vector<10x128xf32>
    %33 = arith.maximumf %32, %31 : vector<10x128xf32>
    %34 = vector.broadcast %cst_7 : f32 to vector<10x128xf32>
    %35 = arith.minimumf %34, %33 : vector<10x128xf32>
    %36 = arith.mulf %35, %35 : vector<10x128xf32>
    %cst_8 = arith.constant 1.000000e+00 : f32
    %37 = vector.broadcast %cst_8 : f32 to vector<10x128xf32>
    %38 = arith.subf %37, %36 : vector<10x128xf32>
    %cst_9 = arith.constant 1.000000e-07 : f32
    %39 = vector.broadcast %cst_9 : f32 to vector<10x128xf32>
    %40 = arith.maximumf %38, %39 : vector<10x128xf32>
    %41 = math.sqrt %40 : vector<10x128xf32>
    %cst_10 = arith.constant 0.87758255 : f32
    %42 = vector.broadcast %cst_10 : f32 to vector<10x128xf32>
    %43 = arith.mulf %35, %42 : vector<10x128xf32>
    %cst_11 = arith.constant 0.47942555 : f32
    %44 = vector.broadcast %cst_11 : f32 to vector<10x128xf32>
    %45 = arith.mulf %41, %44 : vector<10x128xf32>
    %46 = arith.subf %43, %45 : vector<10x128xf32>
    %47 = tpu.iota {dimensions = array<i32: 0>} : vector<10x128xi32>
    %48 = vector.broadcast %2 : vector<1x128xi32> to vector<10x128xi32>
    %49 = arith.cmpi eq, %47, %48 : vector<10x128xi32>
    %50 = arith.select %49, %46, %35 : vector<10x128xi1>, vector<10x128xf32>
    %cst_12 = arith.constant 3.200000e+01 : f32
    %51 = vector.broadcast %cst_12 : f32 to vector<10x128xf32>
    %52 = arith.mulf %50, %51 : vector<10x128xf32>
    %c0_13 = arith.constant 0 : index
    %c0_14 = arith.constant 0 : index
    %53 = vector.load %arg4[%c0_13, %c0_14] : memref<10x128xf32, #tpu.memory_space<vmem>>, vector<10x128xf32>
    tpu.vector_store %arg4[%c0_13, %c0_14], %52 {strides = array<i32>} : memref<10x128xf32, #tpu.memory_space<vmem>>, vector<10x128xf32>,
    %cst_15 = arith.constant dense<0xFF800000> : vector<128xf32>
    %54 = vector.multi_reduction <maximumf>, %52, %cst_15 [0] : vector<10x128xf32> to vector<128xf32>
    %55 = vector.shape_cast %54 : vector<128xf32> to vector<1x128xf32>
    %56 = vector.broadcast %55 : vector<1x128xf32> to vector<10x128xf32>
    %57 = arith.subf %52, %56 : vector<10x128xf32>
    %58 = math.exp %57 : vector<10x128xf32>
    %cst_16 = arith.constant dense<0.000000e+00> : vector<128xf32>
    %59 = vector.multi_reduction <add>, %58, %cst_16 [0] : vector<10x128xf32> to vector<128xf32>
    %60 = vector.shape_cast %59 : vector<128xf32> to vector<1x128xf32>
    %61 = math.log %60 : vector<1x128xf32>
    %62 = arith.addf %61, %55 : vector<1x128xf32>
    %cst_17 = arith.constant 0.000000e+00 : f32
    %63 = vector.broadcast %cst_17 : f32 to vector<10x128xf32>
    %64 = arith.select %49, %52, %63 : vector<10x128xi1>, vector<10x128xf32>
    %cst_18 = arith.constant dense<0.000000e+00> : vector<128xf32>
    %65 = vector.multi_reduction <add>, %64, %cst_18 [0] : vector<10x128xf32> to vector<128xf32>
    %66 = vector.shape_cast %65 : vector<128xf32> to vector<1x128xf32>
    %67 = arith.subf %62, %66 : vector<1x128xf32>
    %c0_19 = arith.constant 0 : index
    %c0_20 = arith.constant 0 : index
    %68 = vector.load %arg5[%c0_19, %c0_20] : memref<1x128xf32, #tpu.memory_space<vmem>>, vector<1x128xf32>
    tpu.vector_store %arg5[%c0_19, %c0_20], %67 {strides = array<i32>} : memref<1x128xf32, #tpu.memory_space<vmem>>, vector<1x128xf32>,
    return
  }
  func.func @transform_0(%arg0: i32) -> (i32, i32) {
    %c0_i32 = arith.constant 0 : i32
    %c0_i32_0 = arith.constant 0 : i32
    return %c0_i32, %arg0 : i32, i32
  }
  func.func @transform_1(%arg0: i32) -> (i32, i32) {
    %c0_i32 = arith.constant 0 : i32
    %c0_i32_0 = arith.constant 0 : i32
    %c0_i32_1 = arith.constant 0 : i32
    return %c0_i32, %c0_i32_0 : i32, i32
  }
  func.func @transform_2(%arg0: i32) -> (i32, i32) {
    %c0_i32 = arith.constant 0 : i32
    %c0_i32_0 = arith.constant 0 : i32
    return %c0_i32, %arg0 : i32, i32
  }
  func.func @transform_3(%arg0: i32) -> (i32, i32) {
    %c0_i32 = arith.constant 0 : i32
    %c0_i32_0 = arith.constant 0 : i32
    return %c0_i32, %arg0 : i32, i32
  }
  func.func @transform_4(%arg0: i32) -> (i32, i32) {
    %c0_i32 = arith.constant 0 : i32
    %c0_i32_0 = arith.constant 0 : i32
    return %c0_i32, %arg0 : i32, i32
  }
}

</mosaic_0001>

<bundles_post_ra>
// kernel: tpu_custom_call.1
= control target key start
LH: loop header
LB: loop body
LE: loop exit
PB: predicated region body
PF: predicated region fallthrough
CT: control target
= control target key end

     0   :  { %10 = vsyncpa [#allocation3], 0  ;;  %s897_s0 = inlined_call_operand.vmem [shape: f32[2,256], index: 0, kind: input, shape index: {}]   ;;  %s898_s1 = inlined_call_operand.vmem [shape: f32[10,2], index: 1, kind: input, shape index: {}]   ;;  %s899_s2 = inlined_call_operand.vmem [shape: s32[1,256], index: 2, kind: input, shape index: {}]   ;;  %s900_s3 = inlined_call_operand.hbm [shape: f32[10,256], index: 3, kind: output, shape index: {0}]   ;;  %s901_s4 = inlined_call_operand.hbm [shape: f32[1,256], index: 4, kind: output, shape index: {1}]  }
   0x1   :  { %12 = vsyncpa [#allocation3 + $0x1], 0 }
   0x2   :  { %13 = vsyncpa [#allocation5], 0 }
   0x3   :  { %15 = vsyncpa [#allocation5 + $0x1], 0  ;;  %s719_s15 = smov 0   ;;  %s721_s16 = smov 0  }
   0x4   :  { %s723_s17 = smov 0   ;;  %s725_s18 = smov 0  }
   0x5 LB: > { %s740_s19 = sadd.s32 4294967295, %s684_s18   ;;  %s505_s20 = sadd.s32 4294967294, %s684_s18   ;;  %s684_s18 = sphi %s725_s18, %s907_s18   ;;  %s680_s17 = sphi %s723_s17, %s906_s17   ;;  %s676_s16 = sphi %s721_s16, %s905_s16   ;;  %s672_s15 = sphi %s719_s15, %s904_s15  }
   0x6   : > { %s744_s21 = sadd.s32 1, %s684_s18   ;;  %s101_s22 = sadd.s32 1, %s680_s17 }
   0x7   : > { %s98_s23 = ssub.s32 %s684_s18, %s744_s21  ;;  %p111_p0 = scmp.ne.s32.totalorder %s680_s17, %s676_s16 }
   0x8   : > { %p99_p1 = scmp.eq.s32.totalorder %s98_s23, 0  ;;  %p112_p2 = scmp.eq.s32.totalorder %s740_s19, 1 }
   0x9   : > { %p117_p3 = scmp.ne.s32.totalorder %s676_s16, %s672_s15  ;;  %p118_p4 = scmp.eq.s32.totalorder %s505_s20, 1 }
   0xa   : > { %s755_s24 = scalar_select %p99_p1, %s680_s17, %s101_s22  }
   0xb   : > { %p757_p5 = por %p112_p2, %p111_p0  ;;  %p761_p6 = por %p118_p4, %p117_p3 }
   0xc   : > { %p508_p7 = scmp.ge.s32.totalorder %s684_s18, 1  ;;  %p178_p8 = scmp.lt.s32.totalorder %s684_s18, 3 }
   0xe   : > { %p179_p9 = pnand %p508_p7, %p178_p8 }
   0xf   : > { %v219_v0 = vld [vmem:[%s898_s1 + $0x8] sm:$0x3] (!%p179_p9)  ;;  %v218_v1 = vld [vmem:[%s898_s1] sm:$0xff] (!%p179_p9)  ;;  %v686_v3 = vmov (!%p179_p9), 0   ;;  %s687_s5 = smov (!%p179_p9), 127   ;;  %v688_v13 = vmov (!%p179_p9), 1   ;;  %v228_v23 = vlaneseq (!%p179_p9) }
  0x10   : > { %182 = sbr.rel (%p179_p9) target bundleno = 532 (0x214), region = 32  ;;  %v234_v2 = vmul.f32 (!%p179_p9), %v219_v0, %v219_v0  ;;  %569 = vset.pattern.permute.xlu1 (!%p179_p9), %v686_v3  ;;  %570 = vset.pattern.permute.xlu0 (!%p179_p9), %v686_v3  ;;  %v233_v4 = vmul.f32 (!%p179_p9), %v218_v1, %v218_v1  ;;  %p210_p10 = scmp.lt.s32.totalorder (!%p179_p9), %s740_s19, 1  ;;  %vm338_vm6 = vcmask (!%p179_p9), 1041408  }
  0x11   : > { %v781_v24 = vshrl.u32 (!%p179_p9), %v228_v23, 7  ;;  %s795_s14 = sand.u32 (!%p179_p9), 1, %s676_s16   ;;  %s515_s22 = sshll.u32 (!%p179_p9), %s740_s19, 7 }
  0x12   : > { %239 = vrot.lane.b32.xlu0 (!%p179_p9), %v234_v2, %s687_s5  ;;  %s509_s20 = sshll.u32 (!%p179_p9), %s795_s14, 4  ;;  %s809_s30 = scalar_lea.hbm (!%p179_p9), %s900_s3, %s515_s22 }
  0x13   : > { %v230_v25 = vsub.s32 (!%p179_p9), 0, %v781_v24  ;;  %v287_v28 = vsub.s32 (!%p179_p9), 1, %v781_v24  ;;  %v790_v52 = vadd.s32 (!%p179_p9), 8, %v781_v24  ;;  %s203_s23 = scalar_lea.vmem (!%p179_p9), [#allocation2], %s509_s20 }
  0x14   : > { %s393_s27 = sshll.u32 (!%p179_p9), %s203_s23, 4  ;;  %s814_s27 = int_to_ptr.vmem [resolvable:$true] %s393_s27 }
  0x16   : > { %237 = vrot.lane.b32.xlu0 (!%p179_p9), %v233_v4, %s687_s5  ;;  %s377_s5 = scalar_lea.sflag (!%p179_p9), [#allocation3], %s795_s14 }
  0x17   : > { %s775_s6 = scalar_select %p210_p10, %s740_s19, 1 }
  0x19   : > { %s510_s7 = sshll.u32 %s775_s6, 1  ;;  %s216_s13 = scalar_lea.vmem %s899_s2, %s775_s6 }
  0x1a   : > { %s213_s10 = scalar_lea.vmem %s897_s0, %s510_s7  ;;  %v792_v54 = vld [vmem:[%s216_s13] ss:$0 sm:$0xff]  ;;  %s590_s6 = scalar_lea.vmem %s814_s27, 256 }
  0x1b   : > { %v217_v18 = vld [vmem:[%s213_s10] sm:$0x3]  ;;  %vm331_vm2 = vcmp.eq.s32.totalorder %v790_v52, %v792_v54  ;;  %vm330_vm5 = vcmp.eq.s32.totalorder %v781_v24, %v792_v54  ;;  %p591_p11 = scmp.ne.s32.totalorder %s814_s27, %s590_s6  ;;  %s689_s7 = smov [#allocation2]  }
  0x1c   : > { %v221_v19 = vmul.f32 %v217_v18, %v217_v18  ;;  %s594_s8 = sshll.u32 %s689_s7, 4  ;;  %s595_s8 = int_to_ptr.vmem [resolvable:$false] %s594_s8 }
  0x1d   : > { %p592_p12 = pnand %p591_p11, %p757_p5  ;;  %s596_s9 = scalar_lea.vmem %s595_s8, 512 }
  0x1e   : > { %v223_v20 = vrot.slane %v221_v19, 1  ;;  %p597_p0 = scmp.lt.s32.totalorder %s814_s27, %s595_s8  ;;  %p598_p1 = scmp.lt.s32.totalorder %s596_s9, %s590_s6 }
  0x1f   : > { %p593_p13 = pneg %p592_p12 }
  0x20   : > { %v225_v21 = vadd.f32 %v223_v20, %v221_v19  ;;  %p599_p2 = por %p598_p1, %p597_p0 }
  0x22   : > { %v226_v22 = vmax.f32 %v225_v21, 1e-24  ;;  %p600_p3 = pnand %p599_p2, %p593_p13 }
  0x84   : > { %v240_v5 = vpop.permute.xlu0 %239 }
  0x85   : > { %v244_v6 = vadd.f32 %v240_v5, %v234_v2 }
  0x87   : > { %v246_v7 = vmax.f32 %v244_v6, 1e-24 }
  0x88   : > { %v238_v8 = vpop.permute.xlu0 %237 }
  0x89   : > { %574 = vrsqrt.f32 %v246_v7  ;;  %v243_v9 = vadd.f32 %v238_v8, %v233_v4 }
  0x8b   : > { %v245_v10 = vmax.f32 %v243_v9, 1e-24 }
  0x8d   : > { %576 = vrsqrt.f32 %v245_v10 }
  0x8e   : > { %578 = vrsqrt.f32 %v226_v22 }
  0x93   : > { %v575_v11 = vpop.eup %574 }
  0x94   : > { %256 = vperm.xlu1 %569, %v575_v11  }
  0x97   : > { %v577_v12 = vpop.eup %576 }
  0x98   : > { %251 = vperm.xlu1 %569, %v577_v12   ;;  %v579_v26 = vpop.eup %578 }
  0x99   : > { %v231_v27 = vrot.slane %v579_v26, %v230_v25 }
  0x9b   : > { %v232_v29 = vmul.f32 %v231_v27, %v217_v18 }
  0x9c   : > { %571 = vset.pattern.permute.xlu1 %v688_v13 }
  0x9d   : > { %v288_v30 = vrot.slane %v232_v29, %v287_v28  ;;  %v274_v31 = vrot.slane %v232_v29, %v230_v25 }
 0x113   : > { %v257_v14 = vpop.permute.xlu1 %256 }
 0x114   : > { %v260_v15 = vmul.f32 %v257_v14, %v219_v0 }
 0x116   : > { %268 = vperm.xlu0 %570, %v260_v15   ;;  %282 = vperm.xlu1 %571, %v260_v15  }
 0x117   : > { %v252_v16 = vpop.permute.xlu1 %251 }
 0x118   : > { %v259_v17 = vmul.f32 %v252_v16, %v218_v1 }
 0x11a   : > { %573 = vset.pattern.permute.xlu0 %v688_v13  ;;  %572 = vset.pattern.permute.xlu1 %v686_v3 }
 0x11b   : > { %278 = vperm.xlu0 %573, %v259_v17   ;;  %263 = vperm.xlu1 %572, %v259_v17  }
 0x195   : > { %v283_v32 = vpop.permute.xlu1 %282  ;;  %v269_v33 = vpop.permute.xlu0 %268 }
 0x196   : > { %v290_v34 = vmul.f32 %v288_v30, %v283_v32  ;;  %v276_v35 = vmul.f32 %v274_v31, %v269_v33 }
 0x198   : > { %v292_v36 = vadd.f32 %v290_v34, %v276_v35 }
 0x19a   : > { %v512_v37 = vclamps-f32 %v292_v36, 1.0  ;;  %v264_v38 = vpop.permute.xlu1 %263  ;;  %v279_v39 = vpop.permute.xlu0 %278 }
 0x19b   : > { %v275_v40 = vmul.f32 %v274_v31, %v264_v38  ;;  %v289_v41 = vmul.f32 %v288_v30, %v279_v39 }
 0x19c   : > { %v298_v42 = vmul.f32 %v512_v37, %v512_v37  ;;  %v318_v58 = vmul.f32 0.87758255, %v512_v37 }
 0x19d   : > { %v291_v43 = vadd.f32 %v289_v41, %v275_v40 }
 0x19e   : > { %v300_v44 = vsub.f32 1.0, %v298_v42 }
 0x19f   : > { %v511_v45 = vclamps-f32 %v291_v43, 1.0 }
 0x1a0   : > { %v302_v46 = vmax.f32 %v300_v44, 1e-07 }
 0x1a1   : > { %v297_v47 = vmul.f32 %v511_v45, %v511_v45  ;;  %v317_v3 = vmul.f32 0.87758255, %v511_v45 }
 0x1a2   : > { %580 = vrsqrt.f32 %v302_v46  ;;  %vm312_vm0 = vcmp.eq.f32.partialorder %v302_v46, inf  ;;  %v315_v53 = vand.u32 2147483648, %v302_v46  ;;  %vm314_vm1 = vcmp.eq.f32.partialorder %v302_v46, 0.0 }
 0x1a3   : > { %v299_v48 = vsub.f32 1.0, %v297_v47 }
 0x1a5   : > { %v301_v49 = vmax.f32 %v299_v48, 1e-07 }
 0x1a7   : > { %582 = vrsqrt.f32 %v301_v49  ;;  %vm305_vm3 = vcmp.eq.f32.partialorder %v301_v49, inf  ;;  %v308_v62 = vand.u32 2147483648, %v301_v49  ;;  %vm307_vm4 = vcmp.eq.f32.partialorder %v301_v49, 0.0 }
 0x1ac   : > { %v581_v50 = vpop.eup %580 }
 0x1ad   : > { %v311_v51 = vmul.f32 %v581_v50, %v302_v46 }
 0x1af   : > { %v313_v55 = vsel %vm312_vm0, %v302_v46, %v311_v51 }
 0x1b0   : > { %v316_v56 = vsel %vm314_vm1, %v315_v53, %v313_v55 }
 0x1b1   : > { %v583_v57 = vpop.eup %582  ;;  %v320_v59 = vmul.f32 0.47942555, %v316_v56 }
 0x1b2   : > { %v304_v60 = vmul.f32 %v583_v57, %v301_v49 }
 0x1b3   : > { %v322_v61 = vsub.f32 %v318_v58, %v320_v59 }
 0x1b4   : > { %v306_v63 = vsel %vm305_vm3, %v301_v49, %v304_v60 }
 0x1b5   : > { %v333_v0 = vsel %vm331_vm2, %v322_v61, %v512_v37  ;;  %v309_v1 = vsel %vm307_vm4, %v308_v62, %v306_v63 }
 0x1b6   : > { %v335_v2 = vmul.f32 32.0, %v333_v0  ;;  %v319_v4 = vmul.f32 0.47942555, %v309_v1 }
 0x1b8   : > { %v321_v5 = vsub.f32 %v317_v3, %v319_v4  ;;  %337 = vst [vmem:[%s203_s23 + $0x8] sm:$0x3] %v335_v2  ;;  %v339_v8 = vsel %vm338_vm6, %v335_v2, -inf }
 0x1ba   : > { %v332_v6 = vsel %vm330_vm5, %v321_v5, %v511_v45 }
 0x1bb   : > { %v334_v7 = vmul.f32 32.0, %v332_v6 }
 0x1bd   : > { %v340_v9 = vmax.f32 %v334_v7, %v339_v8  ;;  %336 = vst [vmem:[%s203_s23] sm:$0xff] %v334_v7 }
 0x1be   : > { %603 = shalt.err (!%p600_p3)
}
 0x1bf   : > { %s604_s10 = scalar_lea.hbm %s809_s30, 256  ;;  %s608_s13 = scalar_lea.hbm %s900_s3, 512 }
 0x1c0   : > { %p605_p4 = scmp.ne.s32.totalorder %s809_s30, %s604_s10  ;;  %p609_p9 = scmp.lt.u32.totalorder %s809_s30, %s900_s3 }
 0x1c1   : > { %p610_p10 = scmp.lt.u32.totalorder %s608_s13, %s604_s10  ;;  %p612_p12 = scmp.lt.u32.totalorder %s604_s10, %s809_s30 }
 0x1c2   : > { %p606_p7 = pnand %p605_p4, %p757_p5 }
 0x1c3   : > { %p611_p11 = por %p610_p10, %p609_p9 }
 0x1c4   : > { %p607_p8 = pneg %p606_p7 }
 0x1c5   : > { %p613_p13 = por %p612_p12, %p611_p11 }
 0x1c7   : > { %p614_p0 = pnand %p613_p13, %p607_p8 }
 0x1c9   : > { %617 = shalt.err (!%p614_p0)
}
 0x1ca   : > { %s690_s23 = smov 128   ;;  %s691_s28 = smov 256   ;;  %v341_v10 = vrot.slane %v340_v9, 4  ;;  %v365_v22 = vsel %vm331_vm2, %v335_v2, 0.0  ;;  %v364_v25 = vsel %vm330_vm5, %v334_v7, 0.0 }
 0x1cb   : > { %s692_s29 = smov 8   ;;  %v366_v27 = vsel %vm338_vm6, %v365_v22, 0.0  ;;  %s382_s9 = scalar_lea.sflag [#allocation5], %s795_s14 }
 0x1cc   : > { %519 = dma.vmem_to_hbm [thread:$0]  (%p757_p5), %s814_s27, 256, %s809_s30, %s377_s5, %s690_s23, %s691_s28, %s692_s29   ;;  %v342_v11 = vmax.f32 %v340_v9, %v341_v10  ;;  %v367_v29 = vadd.f32 %v366_v27, %v364_v25 }
 0x1cd   : > { %s516_s27 = sshll.u32 %s740_s19, 4  ;;  %s209_s30 = scalar_lea.vmem [#allocation4], %s795_s14 }
 0x1ce   : > { %v343_v12 = vrot.slane %v342_v11, 2  ;;  %v368_v32 = vrot.slane %v367_v29, 4  ;;  %s409_s5 = sshll.u32 %s209_s30, 4  ;;  %s854_s8 = scalar_lea.hbm %s901_s4, %s516_s27  ;;  %s856_s5 = int_to_ptr.vmem [resolvable:$true] %s409_s5 }
 0x1cf   : > { %s618_s10 = scalar_lea.vmem %s856_s5, 16  ;;  %s693_s19 = smov [#allocation4]  }
 0x1d0   : > { %v344_v13 = vmax.f32 %v342_v11, %v343_v12  ;;  %v369_v35 = vadd.f32 %v368_v32, %v367_v29  ;;  %p619_p1 = scmp.ne.s32.totalorder %s856_s5, %s618_s10  ;;  %s622_s11 = sshll.u32 %s693_s19, 4  ;;  %s623_s11 = int_to_ptr.vmem [resolvable:$false] %s622_s11 }
 0x1d1   : > { %s624_s12 = scalar_lea.vmem %s623_s11, 32  ;;  %p625_p4 = scmp.lt.s32.totalorder %s856_s5, %s623_s11 }
 0x1d2   : > { %v345_v14 = vrot.slane %v344_v13, 1  ;;  %v370_v37 = vrot.slane %v369_v35, 2  ;;  %p620_p2 = pnand %p619_p1, %p757_p5  ;;  %p626_p7 = scmp.lt.s32.totalorder %s624_s12, %s618_s10 }
 0x1d4   : > { %v346_v15 = vmax.f32 %v344_v13, %v345_v14  ;;  %v371_v38 = vadd.f32 %v370_v37, %v369_v35  ;;  %p621_p3 = pneg %p620_p2  ;;  %p627_p8 = por %p626_p7, %p625_p4 }
 0x1d6   : > { %v347_v16 = vsub.f32 %v334_v7, %v346_v15  ;;  %v348_v17 = vsub.f32 %v335_v2, %v346_v15  ;;  %v372_v24 = vrot.slane %v371_v38, 1  ;;  %p628_p9 = pnand %p627_p8, %p621_p3 }
 0x1d8   : > { %v349_v18 = vmul.f32 1.442695, %v347_v16  ;;  %v351_v19 = vmul.f32 1.442695, %v348_v17  ;;  %v373_v42 = vadd.f32 %v372_v24, %v371_v38 }
 0x1da   : > { %584 = vpow2.f32 %v349_v18 }
 0x1db   : > { %586 = vpow2.f32 %v351_v19 }
 0x1e4   : > { %v585_v20 = vpop.eup %584 }
 0x1e5   : > { %v587_v21 = vpop.eup %586 }
 0x1e6   : > { %v353_v23 = vsel %vm338_vm6, %v587_v21, 0.0 }
 0x1e7   : > { %v354_v26 = vadd.f32 %v585_v20, %v353_v23 }
 0x1e9   : > { %v355_v28 = vrot.slane %v354_v26, 4 }
 0x1eb   : > { %v356_v30 = vadd.f32 %v355_v28, %v354_v26 }
 0x1ed   : > { %v357_v31 = vrot.slane %v356_v30, 2 }
 0x1ef   : > { %v358_v33 = vadd.f32 %v357_v31, %v356_v30 }
 0x1f1   : > { %v359_v34 = vrot.slane %v358_v33, 1 }
 0x1f3   : > { %v360_v36 = vadd.f32 %v359_v34, %v358_v33 }
 0x1f5   : > { %588 = vlog2.f32 %v360_v36 }
 0x1ff   : > { %v589_v39 = vpop.eup %588 }
 0x200   : > { %v362_v40 = vmul.f32 0.6931472, %v589_v39 }
 0x202   : > { %v363_v41 = vadd.f32 %v362_v40, %v346_v15 }
 0x204   : > { %v374_v43 = vsub.f32 %v363_v41, %v373_v42 }
 0x206   : > { %375 = vst [vmem:[%s209_s30] sm:$0x1] %v374_v43 }
 0x207   : > { %631 = shalt.err (!%p628_p9)
}
 0x208   : > { %s632_s14 = scalar_lea.hbm %s854_s8, 16  ;;  %s636_s22 = scalar_lea.hbm %s901_s4, 32 }
 0x209   : > { %p633_p10 = scmp.ne.s32.totalorder %s854_s8, %s632_s14  ;;  %p637_p13 = scmp.lt.u32.totalorder %s854_s8, %s901_s4 }
 0x20a   : > { %p638_p0 = scmp.lt.u32.totalorder %s636_s22, %s632_s14  ;;  %p640_p2 = scmp.lt.u32.totalorder %s632_s14, %s854_s8 }
 0x20b   : > { %p634_p11 = pnand %p633_p10, %p757_p5 }
 0x20c   : > { %p639_p1 = por %p638_p0, %p637_p13 }
 0x20d   : > { %p635_p12 = pneg %p634_p11 }
 0x20e   : > { %p641_p3 = por %p640_p2, %p639_p1 }
 0x210   : > { %p642_p4 = pnand %p641_p3, %p635_p12 }
 0x212   : > { %645 = shalt.err (!%p642_p4)
}
 0x213   : > { %520 = dma.vmem_to_hbm [thread:$0]  (%p757_p5), %s856_s5, 16, %s854_s8, %s382_s9  }
 0x214 PF: > { %p530_p7 = scmp.ge.s32.totalorder %s684_s18, 2  ;;  %s421_s29 = sand.u32 1, %s672_s15  }
 0x215   : > { %s422_s27 = scalar_lea.sflag [#allocation3], %s421_s29 }
 0x216   : > { %p524_p8 = pnand %p530_p7, %p761_p6 }
 0x218   : > { %663 = dma.done.wait (!%p524_p8), %s422_s27, 256  }
 0x219   : > { %665 = vsyncadd (!%p524_p8), %s422_s27, 4294967040  ;;  %s431_s30 = scalar_lea.sflag [#allocation5], %s421_s29 }
 0x21a   : > { %667 = dma.done.wait (!%p524_p8), %s431_s30, 16  }
 0x21b   : > { %669 = vsyncadd (!%p524_p8), %s431_s30, 4294967280  ;;  %p18_p5 = scmp.ge.s32.totalorder %s744_s21, 4   ;;  %s904_s15 = smov %s676_s16 }
 0x21c   : > { %s905_s16 = smov %s680_s17  ;;  %s906_s17 = smov %s755_s24 }
 0x21d   : > { %s907_s18 = smov %s744_s21  ;;  %20 = sbr.rel (!%p18_p5) target bundleno = 5 (0x5), region = 87 }
 0x224   :  { %435 = vsyncpa [#allocation3], 1 }
 0x225   :  { %437 = vsyncpa [#allocation3 + $0x1], 1 }
 0x226   :  { %438 = vsyncpa [#allocation5], 1 }
 0x227   :  { %440 = vsyncpa [#allocation5 + $0x1], 1 }

</bundles_post_ra>
